<compile_context>
chip_gen: v5e
topology: v5e:2x2
jax: 0.10.0
libtpu: 0.0.40
codegen_flags: <defaults>
</compile_context>

<pallas_src>
import functools
import math

import jax
import jax.numpy as jnp
from jax.experimental import pallas as pl
from jax.experimental.pallas import tpu as pltpu


def _rotate_gather_kernel(src_ref, x_ref, o_ref, *, replace):
    """Nearest-neighbour gather for one tile of flattened image planes.

    src_ref: VMEM (1, HW) int32  -- flattened source pixel index per output
             pixel; -1 marks out-of-bounds pixels (filled with `replace`).
             Shared by every plane; identical for every grid step.
    x_ref:   VMEM (TP, HW)       -- TP flattened (H*W) image planes.
    o_ref:   VMEM (TP, HW)
    """
    src = src_ref[...]                                     # (1, HW) int32
    hw = src.shape[-1]

    # One-hot selection matrix sel[q, p] = 1 iff input flat-pixel q is the
    # source of output flat-pixel p.  Built once per grid step, reused by all
    # TP planes; the gather itself is a single lane-dense MXU matmul (exact
    # for 0/1 weights).  Rows with src == -1 match nothing -> 0, filled below.
    q_idx = jax.lax.broadcasted_iota(jnp.int32, (hw, hw), 0)
    sel = (q_idx == src).astype(jnp.float32)               # (HW, HW)

    planes = x_ref[...].astype(jnp.float32)                # (TP, HW)
    gathered = jnp.dot(planes, sel, preferred_element_type=jnp.float32)

    valid = src >= 0                                       # (1, HW) broadcast
    o_ref[...] = jnp.where(valid, gathered, replace).astype(o_ref.dtype)


def _source_index_map(H, W, cos_t, sin_t):
    """PIL Image.rotate (expand=False, NEAREST) inverse pixel mapping.

    Returns a (1, H*W) int32 array: flattened input index feeding each output
    pixel, or -1 where the source falls outside the image.
    Computed once per call (it is invariant across batch/channels/grid steps).
    """
    cx, cy = W / 2.0, H / 2.0
    # PIL uses angle' = -radians(deg); inverse affine (output -> input):
    #   x_in = cos*x - sin*y + c0 ,  y_in = sin*x + cos*y + f0
    c0 = cx - (cos_t * cx - sin_t * cy)
    f0 = cy - (sin_t * cx + cos_t * cy)
    ys = (jnp.arange(H, dtype=jnp.float32) + 0.5)[:, None]   # pixel centers
    xs = (jnp.arange(W, dtype=jnp.float32) + 0.5)[None, :]
    src_xf = cos_t * xs - sin_t * ys + c0
    src_yf = sin_t * xs + cos_t * ys + f0
    src_x = jnp.floor(src_xf).astype(jnp.int32)               # PIL COORD()
    src_y = jnp.floor(src_yf).astype(jnp.int32)
    valid = (src_x >= 0) & (src_x < W) & (src_y >= 0) & (src_y < H)
    src = jnp.where(valid, src_y * W + src_x, -1)
    return src.reshape(1, H * W)


def rotate_pallas(image, cos_t, sin_t, replace):
    """image: (B, C, H, W); cos_t/sin_t: traced f32 scalars of the rotation."""
    B, C, H, W = image.shape
    BC, HW = B * C, H * W

    src = _source_index_map(H, W, cos_t, sin_t)               # (1, HW) int32
    x2d = image.reshape(BC, HW)                               # lane-dense layout

    # Plane tile: all planes in a single block when small (one grid step);
    # otherwise 256-plane tiles (multiple of 8 sublanes).  HW stays untiled so
    # output stores are lane-dense; blocks stay far below VMEM limits on
    # v5e/v6e (128 MiB) and v7x (64 MiB).
    TP = BC if BC <= 256 else 256
    grid = (pl.cdiv(BC, TP),)

    kernel = functools.partial(_rotate_gather_kernel, replace=float(replace))

    out2d = pl.pallas_call(
        kernel,
        out_shape=jax.ShapeDtypeStruct((BC, HW), image.dtype),
        grid=grid,
        in_specs=[
            pl.BlockSpec((1, HW), lambda i: (0, 0)),          # shared src map
            pl.BlockSpec((TP, HW), lambda i: (i, 0)),         # image planes
        ],
        out_specs=pl.BlockSpec((TP, HW), lambda i: (i, 0)),
        compiler_params=pltpu.CompilerParams(
            dimension_semantics=("parallel",)),
    )(src, x2d)
    # TODO(synk): the (HW, HW) one-hot gather is sized for augmentation-scale
    # thumbnails; large images would need a banded / dynamic-gather variant.
    return out2d.reshape(B, C, H, W)


class Rotate:
    """JAX/Pallas port of the PyTorch `Rotate` augmentation."""

    def __init__(self, p, degrees, replace=128, minus=True):
        self.p = float(p)
        self.degrees = float(degrees)
        self.replace = float(replace)
        self.minus = minus

    def effective_cos_sin(self, key):
        k1, k2 = jax.random.split(key)
        if self.minus:
            sign = jnp.where(jax.random.uniform(k1) < 0.5, -1.0, 1.0)
        else:
            sign = jnp.float32(1.0)
        # TODO(synk): the PyTorch module writes the flipped sign back into
        # self.degrees (stateful, compounds across calls); we keep the per-call
        # distribution but do not mutate module state.
        apply = jax.random.uniform(k2) < self.p
        deg = jnp.where(apply, sign * self.degrees, 0.0)      # 0 deg == identity
        theta = deg * (math.pi / 180.0)
        return (jnp.cos(theta).astype(jnp.float32),
                jnp.sin(theta).astype(jnp.float32))

    def __call__(self, image, key):
        cos_t, sin_t = self.effective_cos_sin(key)
        return rotate_pallas(image, cos_t, sin_t, self.replace)

    def __repr__(self):
        return "Rotate(p={0}, degrees={1})".format(self.p, self.degrees)


if __name__ == "__main__":
    key = jax.random.PRNGKey(0)
    k_img, k_aug = jax.random.split(key)

    # Small NCHW image batch: batch=2, channels=4, spatial=16x16.
    B, C, H, W = 2, 4, 16, 16
    image = jax.random.uniform(k_img, (B, C, H, W), dtype=jnp.float32) * 255.0

    module = Rotate(p=1.0, degrees=30.0, replace=128, minus=True)
    out = jax.block_until_ready(module(image, k_aug))
    assert out.shape == image.shape and out.dtype == image.dtype

    # Pure-JAX reference sharing the same (deterministic) random decisions and
    # the same source-index map -> exact nearest-neighbour PIL-rotate check.
    cos_t, sin_t = module.effective_cos_sin(k_aug)
    src = _source_index_map(H, W, cos_t, sin_t)               # (1, HW)
    x2d = image.reshape(B * C, H * W)
    safe = jnp.where(src >= 0, src, 0)
    gathered = jnp.take_along_axis(x2d, jnp.broadcast_to(safe, x2d.shape), axis=1)
    ref = jnp.where(src >= 0, gathered, module.replace).reshape(B, C, H, W)
    assert jnp.allclose(out, ref, atol=1e-4), "mismatch vs reference"

    print("KERNEL_OK")
</pallas_src>

<mosaic_0001>
module attributes {stable_mosaic.version = 11 : i64} {
  func.func @_rotate_gather_kernel(%arg0: i32, %arg1: memref<1x256xi32, #tpu.memory_space<vmem>>, %arg2: memref<8x256xf32, #tpu.memory_space<vmem>>, %arg3: memref<8x256xf32, #tpu.memory_space<vmem>>) attributes {dimension_semantics = [#tpu.dimension_semantics<parallel>], iteration_bounds = array<i64: 1>, scalar_prefetch = 0 : i64, scratch_operands = 0 : i64, tpu.core_type = #tpu.core_type<tc>, window_params = [{pipeline_mode = #tpu.pipeline_mode<synchronous>, transform_indices = @transform_0, window_bounds = array<i64: 1, 256>}, {transform_indices = @transform_1, window_bounds = array<i64: 8, 256>}, {transform_indices = @transform_2, window_bounds = array<i64: 8, 256>}]} {
    %c0 = arith.constant 0 : index
    %c0_0 = arith.constant 0 : index
    %0 = vector.load %arg1[%c0, %c0_0] : memref<1x256xi32, #tpu.memory_space<vmem>>, vector<1x256xi32>
    %1 = tpu.iota {dimensions = array<i32: 0>} : vector<256x256xi32>
    %2 = vector.broadcast %0 : vector<1x256xi32> to vector<256x256xi32>
    %3 = arith.cmpi eq, %1, %2 : vector<256x256xi32>
    %4 = arith.extui %3 : vector<256x256xi1> to vector<256x256xi32>
    %5 = arith.sitofp %4 : vector<256x256xi32> to vector<256x256xf32>
    %c0_1 = arith.constant 0 : index
    %c0_2 = arith.constant 0 : index
    %6 = vector.load %arg2[%c0_1, %c0_2] : memref<8x256xf32, #tpu.memory_space<vmem>>, vector<8x256xf32>
    %cst = arith.constant dense<0.000000e+00> : vector<8x256xf32>
    %7 = tpu.matmul %6, %5, %cst {dimension_numbers = #tpu.dot_dimension_numbers<[1], [0], [0], [1], [0, 0, 1, 1], [], []>} : vector<8x256xf32>, vector<256x256xf32>, vector<8x256xf32> -> vector<8x256xf32>
    %c0_i32 = arith.constant 0 : i32
    %8 = vector.broadcast %c0_i32 : i32 to vector<1x256xi32>
    %9 = arith.cmpi sge, %0, %8 : vector<1x256xi32>
    %cst_3 = arith.constant 1.280000e+02 : f32
    %10 = vector.shape_cast %9 : vector<1x256xi1> to vector<1x256xi1>
    %11 = vector.broadcast %10 : vector<1x256xi1> to vector<8x256xi1>
    %12 = vector.broadcast %cst_3 : f32 to vector<8x256xf32>
    %13 = arith.select %11, %7, %12 : vector<8x256xi1>, vector<8x256xf32>
    %c0_4 = arith.constant 0 : index
    %c0_5 = arith.constant 0 : index
    %14 = vector.load %arg3[%c0_4, %c0_5] : memref<8x256xf32, #tpu.memory_space<vmem>>, vector<8x256xf32>
    tpu.vector_store %arg3[%c0_4, %c0_5], %13 {strides = array<i32>} : memref<8x256xf32, #tpu.memory_space<vmem>>, vector<8x256xf32>,
    return
  }
  func.func @transform_0(%arg0: i32) -> (i32, i32) {
    %c0_i32 = arith.constant 0 : i32
    %c0_i32_0 = arith.constant 0 : i32
    %c0_i32_1 = arith.constant 0 : i32
    return %c0_i32, %c0_i32_0 : i32, i32
  }
  func.func @transform_1(%arg0: i32) -> (i32, i32) {
    %c0_i32 = arith.constant 0 : i32
    %c0_i32_0 = arith.constant 0 : i32
    return %arg0, %c0_i32 : i32, i32
  }
  func.func @transform_2(%arg0: i32) -> (i32, i32) {
    %c0_i32 = arith.constant 0 : i32
    %c0_i32_0 = arith.constant 0 : i32
    return %arg0, %c0_i32 : i32, i32
  }
}

</mosaic_0001>

<bundles_post_ra>
// kernel: tpu_custom_call.1
= control target key start
LH: loop header
LB: loop body
LE: loop exit
PB: predicated region body
PF: predicated region fallthrough
CT: control target
= control target key end

     0   :  { %7 = vsyncpa [#allocation3], 0  ;;  %s790_s0 = inlined_call_operand.hbm [shape: s32[1,256], index: 0, kind: input, shape index: {}]   ;;  %s791_s1 = inlined_call_operand.hbm [shape: f32[8,256], index: 1, kind: input, shape index: {}]   ;;  %s792_s2 = inlined_call_operand.hbm [shape: f32[8,256], index: 2, kind: output, shape index: {}]  }
   0x1   :  { %8 = vsyncpa [#allocation6], 0 }
   0x2   :  { %9 = vsyncpa [#allocation4], 0  ;;  %s15_s11 = sshll.u32 %s790_s0, 4  ;;  %s589_s12 = smov [#allocation2]   ;;  %s16_s11 = int_to_ptr.hbm [resolvable:$true] %s15_s11 }
   0x3   :  { %s17_s13 = sshll.u32 %s589_s12, 4  ;;  %s26_s16 = sshll.u32 %s791_s1, 4  ;;  %s18_s13 = int_to_ptr.vmem [resolvable:$true] %s17_s13  ;;  %s27_s16 = int_to_ptr.hbm [resolvable:$true] %s26_s16 }
   0x4   :  { %20 = dma.hbm_to_vmem [thread:$0]  %s16_s11, 32, %s18_s13, [#allocation3]  }
   0x5   :  { %s590_s17 = smov [#allocation5]  }
   0x6   :  { %s28_s18 = sshll.u32 %s590_s17, 4  ;;  %s29_s18 = int_to_ptr.vmem [resolvable:$true] %s28_s18 }
   0x7   :  { %31 = dma.hbm_to_vmem [thread:$0]  %s27_s16, 256, %s29_s18, [#allocation6]  }
   0x8   :  { %583 = dma.done.wait [#allocation3], 32  }
   0x9   :  { %584 = vsyncadd [#allocation3], 4294967264 }
   0xa   :  { %585 = dma.done.wait [#allocation6], 256  }
   0xb   :  { %586 = vsyncadd [#allocation6], 4294967040  ;;  %v41_v0 = vlaneseq  ;;  %v621_v6 = vld [vmem:[#allocation2] sm:$0x3]  ;;  %v591_v13 = vmov 1.0   ;;  %v268_v37 = vld [vmem:[#allocation5] sm:$0xff] }
   0xc   :  { %v624_v7 = vperm.slane %v621_v6, 0  ;;  %v627_v8 = vperm.slane %v621_v6, 1  ;;  %v269_v38 = vld [vmem:[#allocation5 + $0x8] sm:$0xff]  ;;  %v592_v39 = vmov 0   ;;  %s593_s0 = smov [#allocation7]   ;;  %s367_s21 = sshll.u32 %s792_s2, 4  ;;  %s368_s21 = int_to_ptr.hbm [resolvable:$true] %s367_s21 }
   0xd   :  { %v615_v1 = vshrl.u32 %v41_v0, 7  ;;  %s365_s1 = sshll.u32 %s593_s0, 4  ;;  %s366_s1 = int_to_ptr.vmem [resolvable:$true] %s365_s1 }
   0xf   :  { %v57_v2 = vadd.s32 120, %v615_v1  ;;  %v73_v3 = vadd.s32 248, %v615_v1  ;;  %v56_v4 = vadd.s32 112, %v615_v1  ;;  %v72_v5 = vadd.s32 240, %v615_v1 }
  0x10   :  { %v55_v9 = vadd.s32 104, %v615_v1  ;;  %v71_v10 = vadd.s32 232, %v615_v1  ;;  %v54_v11 = vadd.s32 96, %v615_v1  ;;  %v70_v12 = vadd.s32 224, %v615_v1 }
  0x11   :  { %vm107_vm0 = vcmp.eq.s32.totalorder %v57_v2, %v627_v8  ;;  %vm139_vm1 = vcmp.eq.s32.totalorder %v73_v3, %v627_v8  ;;  %vm105_vm2 = vcmp.eq.s32.totalorder %v56_v4, %v627_v8  ;;  %vm137_vm3 = vcmp.eq.s32.totalorder %v72_v5, %v627_v8 }
  0x12   :  { %474 = vmatpush.msk.msra.mxu2 %vm107_vm0, %v591_v13  ;;  %490 = vmatpush.msk.msra.mxu3 %vm139_vm1, %v591_v13  ;;  %vm106_vm4 = vcmp.eq.s32.totalorder %v57_v2, %v624_v7  ;;  %v53_v14 = vadd.s32 88, %v615_v1  ;;  %v69_v15 = vadd.s32 216, %v615_v1  ;;  %vm103_vm5 = vcmp.eq.s32.totalorder %v55_v9, %v627_v8 }
  0x13   :  { %vm135_vm6 = vcmp.eq.s32.totalorder %v71_v10, %v627_v8  ;;  %442 = vmatpush.msk.msra.mxu0 %vm106_vm4, %v591_v13  ;;  %vm138_vm7 = vcmp.eq.s32.totalorder %v73_v3, %v624_v7  ;;  %vm104_vm8 = vcmp.eq.s32.totalorder %v56_v4, %v624_v7  ;;  %vm136_vm9 = vcmp.eq.s32.totalorder %v72_v5, %v624_v7 }
  0x14   :  { %475 = vmatpush.msk.msra.mxu2 %vm105_vm2, %v591_v13  ;;  %491 = vmatpush.msk.msra.mxu3 %vm137_vm3, %v591_v13  ;;  %v52_v16 = vadd.s32 80, %v615_v1  ;;  %vm101_vm10 = vcmp.eq.s32.totalorder %v54_v11, %v627_v8  ;;  %vm133_vm11 = vcmp.eq.s32.totalorder %v70_v12, %v627_v8  ;;  %vm102_vm12 = vcmp.eq.s32.totalorder %v55_v9, %v624_v7 }
  0x15   :  { %458 = vmatpush.msk.msra.mxu1 %vm138_vm7, %v591_v13  ;;  %443 = vmatpush.msk.msra.mxu0 %vm104_vm8, %v591_v13  ;;  %v68_v17 = vadd.s32 208, %v615_v1  ;;  %vm134_vm13 = vcmp.eq.s32.totalorder %v71_v10, %v624_v7  ;;  %vm100_vm14 = vcmp.eq.s32.totalorder %v54_v11, %v624_v7  ;;  %vm99_vm15 = vcmp.eq.s32.totalorder %v53_v14, %v627_v8 }
  0x16   :  { %476 = vmatpush.msk.msra.mxu2 %vm103_vm5, %v591_v13  ;;  %492 = vmatpush.msk.msra.mxu3 %vm135_vm6, %v591_v13  ;;  %vm131_vm0 = vcmp.eq.s32.totalorder %v69_v15, %v627_v8  ;;  %v51_v18 = vadd.s32 72, %v615_v1  ;;  %v67_v19 = vadd.s32 200, %v615_v1  ;;  %vm132_vm1 = vcmp.eq.s32.totalorder %v70_v12, %v624_v7 }
  0x17   :  { %459 = vmatpush.msk.msra.mxu1 %vm136_vm9, %v591_v13  ;;  %444 = vmatpush.msk.msra.mxu0 %vm102_vm12, %v591_v13  ;;  %vm98_vm2 = vcmp.eq.s32.totalorder %v53_v14, %v624_v7  ;;  %vm97_vm3 = vcmp.eq.s32.totalorder %v52_v16, %v627_v8  ;;  %vm129_vm4 = vcmp.eq.s32.totalorder %v68_v17, %v627_v8  ;;  %v50_v20 = vadd.s32 64, %v615_v1 }
  0x18   :  { %477 = vmatpush.msk.msra.mxu2 %vm101_vm10, %v591_v13  ;;  %493 = vmatpush.msk.msra.mxu3 %vm133_vm11, %v591_v13  ;;  %v66_v21 = vadd.s32 192, %v615_v1  ;;  %vm130_vm5 = vcmp.eq.s32.totalorder %v69_v15, %v624_v7  ;;  %vm96_vm6 = vcmp.eq.s32.totalorder %v52_v16, %v624_v7  ;;  %vm95_vm7 = vcmp.eq.s32.totalorder %v51_v18, %v627_v8 }
  0x19   :  { %460 = vmatpush.msk.msra.mxu1 %vm134_vm13, %v591_v13  ;;  %445 = vmatpush.msk.msra.mxu0 %vm100_vm14, %v591_v13  ;;  %vm127_vm8 = vcmp.eq.s32.totalorder %v67_v19, %v627_v8  ;;  %v49_v22 = vadd.s32 56, %v615_v1  ;;  %v65_v23 = vadd.s32 184, %v615_v1  ;;  %vm128_vm9 = vcmp.eq.s32.totalorder %v68_v17, %v624_v7 }
  0x1a   :  { %478 = vmatpush.msk.msra.mxu2 %vm99_vm15, %v591_v13  ;;  %494 = vmatpush.msk.msra.mxu3 %vm131_vm0, %v591_v13  ;;  %vm94_vm10 = vcmp.eq.s32.totalorder %v51_v18, %v624_v7  ;;  %vm93_vm11 = vcmp.eq.s32.totalorder %v50_v20, %v627_v8  ;;  %vm125_vm12 = vcmp.eq.s32.totalorder %v66_v21, %v627_v8  ;;  %v48_v24 = vadd.s32 48, %v615_v1 }
  0x1b   :  { %461 = vmatpush.msk.msra.mxu1 %vm132_vm1, %v591_v13  ;;  %446 = vmatpush.msk.msra.mxu0 %vm98_vm2, %v591_v13  ;;  %v64_v25 = vadd.s32 176, %v615_v1  ;;  %vm126_vm13 = vcmp.eq.s32.totalorder %v67_v19, %v624_v7  ;;  %vm92_vm14 = vcmp.eq.s32.totalorder %v50_v20, %v624_v7  ;;  %vm91_vm15 = vcmp.eq.s32.totalorder %v49_v22, %v627_v8 }
  0x1c   :  { %479 = vmatpush.msk.msra.mxu2 %vm97_vm3, %v591_v13  ;;  %495 = vmatpush.msk.msra.mxu3 %vm129_vm4, %v591_v13  ;;  %vm123_vm0 = vcmp.eq.s32.totalorder %v65_v23, %v627_v8  ;;  %v47_v26 = vadd.s32 40, %v615_v1  ;;  %v63_v27 = vadd.s32 168, %v615_v1  ;;  %vm124_vm1 = vcmp.eq.s32.totalorder %v66_v21, %v624_v7 }
  0x1d   :  { %462 = vmatpush.msk.msra.mxu1 %vm130_vm5, %v591_v13  ;;  %447 = vmatpush.msk.msra.mxu0 %vm96_vm6, %v591_v13  ;;  %vm90_vm2 = vcmp.eq.s32.totalorder %v49_v22, %v624_v7  ;;  %vm89_vm3 = vcmp.eq.s32.totalorder %v48_v24, %v627_v8  ;;  %vm121_vm4 = vcmp.eq.s32.totalorder %v64_v25, %v627_v8  ;;  %v46_v28 = vadd.s32 32, %v615_v1 }
  0x1e   :  { %480 = vmatpush.msk.msra.mxu2 %vm95_vm7, %v591_v13  ;;  %496 = vmatpush.msk.msra.mxu3 %vm127_vm8, %v591_v13  ;;  %v62_v29 = vadd.s32 160, %v615_v1  ;;  %vm122_vm5 = vcmp.eq.s32.totalorder %v65_v23, %v624_v7  ;;  %vm88_vm6 = vcmp.eq.s32.totalorder %v48_v24, %v624_v7  ;;  %vm87_vm7 = vcmp.eq.s32.totalorder %v47_v26, %v627_v8 }
  0x1f   :  { %463 = vmatpush.msk.msra.mxu1 %vm128_vm9, %v591_v13  ;;  %448 = vmatpush.msk.msra.mxu0 %vm94_vm10, %v591_v13  ;;  %vm119_vm8 = vcmp.eq.s32.totalorder %v63_v27, %v627_v8  ;;  %v45_v30 = vadd.s32 24, %v615_v1  ;;  %v61_v31 = vadd.s32 152, %v615_v1  ;;  %vm120_vm9 = vcmp.eq.s32.totalorder %v64_v25, %v624_v7 }
  0x20   :  { %481 = vmatpush.msk.msra.mxu2 %vm93_vm11, %v591_v13  ;;  %497 = vmatpush.msk.msra.mxu3 %vm125_vm12, %v591_v13  ;;  %vm86_vm10 = vcmp.eq.s32.totalorder %v47_v26, %v624_v7  ;;  %vm85_vm11 = vcmp.eq.s32.totalorder %v46_v28, %v627_v8  ;;  %vm117_vm12 = vcmp.eq.s32.totalorder %v62_v29, %v627_v8  ;;  %v44_v32 = vadd.s32 16, %v615_v1 }
  0x21   :  { %464 = vmatpush.msk.msra.mxu1 %vm126_vm13, %v591_v13  ;;  %449 = vmatpush.msk.msra.mxu0 %vm92_vm14, %v591_v13  ;;  %v60_v33 = vadd.s32 144, %v615_v1  ;;  %vm118_vm13 = vcmp.eq.s32.totalorder %v63_v27, %v624_v7  ;;  %vm84_vm14 = vcmp.eq.s32.totalorder %v46_v28, %v624_v7  ;;  %v43_v34 = vadd.s32 8, %v615_v1 }
  0x22   :  { %482 = vmatpush.msk.msra.mxu2 %vm91_vm15, %v591_v13  ;;  %498 = vmatpush.msk.msra.mxu3 %vm123_vm0, %v591_v13  ;;  %vm83_vm15 = vcmp.eq.s32.totalorder %v45_v30, %v627_v8  ;;  %vm115_vm0 = vcmp.eq.s32.totalorder %v61_v31, %v627_v8  ;;  %v59_v35 = vadd.s32 136, %v615_v1  ;;  %v58_v36 = vadd.s32 128, %v615_v1 }
  0x23   :  { %465 = vmatpush.msk.msra.mxu1 %vm124_vm1, %v591_v13  ;;  %450 = vmatpush.msk.msra.mxu0 %vm90_vm2, %v591_v13  ;;  %vm116_vm1 = vcmp.eq.s32.totalorder %v62_v29, %v624_v7  ;;  %vm82_vm2 = vcmp.eq.s32.totalorder %v45_v30, %v624_v7 }
  0x24   :  { %483 = vmatpush.msk.msra.mxu2 %vm89_vm3, %v591_v13  ;;  %499 = vmatpush.msk.msra.mxu3 %vm121_vm4, %v591_v13  ;;  %vm81_vm3 = vcmp.eq.s32.totalorder %v44_v32, %v627_v8  ;;  %vm113_vm4 = vcmp.eq.s32.totalorder %v60_v33, %v627_v8 }
  0x25   :  { %466 = vmatpush.msk.msra.mxu1 %vm122_vm5, %v591_v13  ;;  %451 = vmatpush.msk.msra.mxu0 %vm88_vm6, %v591_v13  ;;  %vm114_vm5 = vcmp.eq.s32.totalorder %v61_v31, %v624_v7  ;;  %vm80_vm6 = vcmp.eq.s32.totalorder %v44_v32, %v624_v7 }
  0x26   :  { %484 = vmatpush.msk.msra.mxu2 %vm87_vm7, %v591_v13  ;;  %500 = vmatpush.msk.msra.mxu3 %vm119_vm8, %v591_v13  ;;  %vm79_vm7 = vcmp.eq.s32.totalorder %v43_v34, %v627_v8  ;;  %vm111_vm8 = vcmp.eq.s32.totalorder %v59_v35, %v627_v8 }
  0x27   :  { %467 = vmatpush.msk.msra.mxu1 %vm120_vm9, %v591_v13  ;;  %452 = vmatpush.msk.msra.mxu0 %vm86_vm10, %v591_v13  ;;  %vm112_vm9 = vcmp.eq.s32.totalorder %v60_v33, %v624_v7  ;;  %vm78_vm10 = vcmp.eq.s32.totalorder %v43_v34, %v624_v7 }
  0x28   :  { %485 = vmatpush.msk.msra.mxu2 %vm85_vm11, %v591_v13  ;;  %501 = vmatpush.msk.msra.mxu3 %vm117_vm12, %v591_v13  ;;  %vm77_vm11 = vcmp.eq.s32.totalorder %v615_v1, %v627_v8  ;;  %vm109_vm12 = vcmp.eq.s32.totalorder %v58_v36, %v627_v8 }
  0x29   :  { %468 = vmatpush.msk.msra.mxu1 %vm118_vm13, %v591_v13  ;;  %453 = vmatpush.msk.msra.mxu0 %vm84_vm14, %v591_v13  ;;  %vm110_vm13 = vcmp.eq.s32.totalorder %v59_v35, %v624_v7  ;;  %vm76_vm14 = vcmp.eq.s32.totalorder %v615_v1, %v624_v7 }
  0x2a   :  { %486 = vmatpush.msk.msra.mxu2 %vm83_vm15, %v591_v13  ;;  %502 = vmatpush.msk.msra.mxu3 %vm115_vm0, %v591_v13  ;;  %vm108_vm15 = vcmp.eq.s32.totalorder %v58_v36, %v624_v7  ;;  %vm350_vm0 = vcmp.ge.s32.totalorder %v621_v6, 0 }
  0x2b   :  { %469 = vmatpush.msk.msra.mxu1 %vm116_vm1, %v591_v13  ;;  %454 = vmatpush.msk.msra.mxu0 %vm82_vm2, %v591_v13  ;;  %v351_v40 = vsel %vm350_vm0, 1, %v592_v39 }
  0x2c   :  { %487 = vmatpush.msk.msra.mxu2 %vm81_vm3, %v591_v13  ;;  %503 = vmatpush.msk.msra.mxu3 %vm113_vm4, %v591_v13  ;;  %v352_v41 = vperm.slane %v351_v40, 0  ;;  %v353_v43 = vperm.slane %v351_v40, 1 }
  0x2d   :  { %470 = vmatpush.msk.msra.mxu1 %vm114_vm5, %v591_v13  ;;  %455 = vmatpush.msk.msra.mxu0 %vm80_vm6, %v591_v13 }
  0x2e   :  { %488 = vmatpush.msk.msra.mxu2 %vm79_vm7, %v591_v13  ;;  %504 = vmatpush.msk.msra.mxu3 %vm111_vm8, %v591_v13  ;;  %vm354_vm1 = vcmp.eq.s32.totalorder %v352_v41, 1  ;;  %vm355_vm2 = vcmp.eq.s32.totalorder %v353_v43, 1 }
  0x2f   :  { %471 = vmatpush.msk.msra.mxu1 %vm112_vm9, %v591_v13  ;;  %456 = vmatpush.msk.msra.mxu0 %vm78_vm10, %v591_v13 }
  0x30   :  { %489 = vmatpush.msk.msra.mxu2 %vm77_vm11, %v591_v13  ;;  %505 = vmatpush.msk.msra.mxu3 %vm109_vm12, %v591_v13 }
  0x31   :  { %326 = vmatmul.f32.vlgmr.msra.gmra.mxu2 %v268_v37  ;;  %346 = vmatmul.f32.vlgmr.msra.gmra.mxu3 %v269_v38 }
  0x32   :  { %472 = vmatpush.msk.msra.mxu1 %vm110_vm13, %v591_v13  ;;  %457 = vmatpush.msk.msra.mxu0 %vm76_vm14, %v591_v13 }
  0x33   :  { %286 = vmatmul.f32.vlgmr.msra.gmra.mxu0 %v268_v37 }
  0x34   :  { %473 = vmatpush.msk.msra.mxu1 %vm108_vm15, %v591_v13 }
  0x35   :  { %306 = vmatmul.f32.vlgmr.msra.gmra.mxu1 %v269_v38 }
  0xb0   :  { %v287_v42 = vpop.f32.mrf.mxu0 }
  0xb2   :  { %v307_v44 = vpop.f32.mrf.mxu1 }
  0xb3   :  { %v308_v45 = vadd.f32 %v307_v44, %v287_v42 }
  0xb4   :  { %v327_v46 = vpop.f32.mrf.mxu2  ;;  %v347_v47 = vpop.f32.mrf.mxu3 }
  0xb5   :  { %v356_v48 = vsel %vm354_vm1, %v308_v45, 128.0  ;;  %v348_v49 = vadd.f32 %v347_v47, %v327_v46 }
  0xb6   :  { %358 = vst [vmem:[#allocation7] sm:$0xff] %v356_v48 }
  0xb7   :  { %v357_v50 = vsel %vm355_vm2, %v348_v49, 128.0 }
  0xb8   :  { %359 = vst [vmem:[#allocation7 + $0x8] sm:$0xff] %v357_v50 }
  0xb9   :  { %370 = dma.vmem_to_hbm [thread:$0]  %s366_s1, 256, %s368_s21, [#allocation4]  }
  0xba   :  { %587 = dma.done.wait [#allocation4], 256  }
  0xbb   :  { %588 = vsyncadd [#allocation4], 4294967040 }
  0xbc   :  { %375 = vsyncpa [#allocation3], 1 }
  0xbd   :  { %376 = vsyncpa [#allocation6], 1 }
  0xbe   :  { %377 = vsyncpa [#allocation4], 1 }

</bundles_post_ra>
